<compile_context>
chip_gen: v7x
topology: tpu7x:2x2x1
jax: 0.10.0
libtpu: 0.0.40
codegen_flags: <defaults>
</compile_context>

<pallas_src>
import jax
import jax.numpy as jnp
from jax import lax
from jax.experimental import pallas as pl
from jax.experimental.pallas import tpu as pltpu


def _mtl_kernel(nrows_ref, w_ref, out_ref, lab_ref, partial_ref):
    """nrows_ref: SMEM (1,) int32   true batch size B (scalar prefetch).
    w_ref:        VMEM (1, T)       column weights (task weight / (B*D)).
    out_ref, lab_ref: VMEM (tile_b, T) batch tile of outputs / labels.
    partial_ref:  VMEM (8, 128)     lane-dense per-tile partial loss output."""
    tile_b = out_ref.shape[0]
    start = pl.program_id(0) * tile_b
    # Mask rows past the true batch size (last tile may be ragged; its
    # out-of-bounds rows contain garbage that must not reach the reduce).
    row = lax.broadcasted_iota(jnp.int32, (tile_b, 1), 0)
    valid = (start + row) < nrows_ref[0]

    o = out_ref[...].astype(jnp.float32)
    l = lab_ref[...].astype(jnp.float32)
    diff = jnp.where(valid, o - l, 0.0)

    # Two-stage reduction: sublane sum (tile_b, T) -> (1, T), then the
    # weight multiply touches only one row before the lane reduce.
    sse_cols = jnp.sum(diff * diff, axis=0, keepdims=True)
    partial = jnp.sum(w_ref[...] * sse_cols)

    # Broadcast the scalar to a full (8, 128) slab -> unmasked lane-dense store.
    partial_ref[...] = jnp.full(partial_ref.shape, partial, dtype=jnp.float32)


def multi_task_loss(outputs, labels, log_variance, num_tasks):
    """Weighted sum of per-task MSE losses + Uncertainty regularization.

    Mirrors MultiTaskLoss.forward(train=True) with an Uncertainty weighter:
    loss_weights are refreshed from log_variance before the weighted sum.
    """
    B, total = outputs.shape
    assert total % num_tasks == 0
    D = total // num_tasks
    itemsize = jnp.dtype(outputs.dtype).itemsize

    # Uncertainty._update_weights(): loss_weights = 0.5 * exp(-log_variance)
    loss_weights = 0.5 * jnp.exp(-log_variance).astype(jnp.float32)
    # Column-weight row with the per-task MSE mean denominator folded in.
    w_row = (jnp.repeat(loss_weights, D) / jnp.float32(B * D)).reshape(1, total)

    # ---- byte-budgeted batch tiling (no padding of the inputs) ----------
    if B < 8:
        # Block equals the full batch dim (allowed by the (8,128) rule).
        tile_b = B
    else:
        budget_bytes = 2 * 1024 * 1024          # ~2 MiB per input tile
        tile_b = max(8, (budget_bytes // (itemsize * total)) // 8 * 8)
        tile_b = min(tile_b, ((B + 7) // 8) * 8)
        # Guarantee >= 2 grid steps when the batch allows, so the
        # "parallel" axis can feed both v7x TensorCores.
        while tile_b > 8 and -(-B // tile_b) < 2:
            tile_b = max(8, ((tile_b // 2) // 8) * 8)
    num_tiles = -(-B // tile_b)

    # Double-buffered working set: 2 inputs x 2 buffers x tile + small extras.
    working_set = 2 * 2 * tile_b * total * itemsize + 4 * (1 * total + 8 * 128) * 4
    vmem_limit = min(32 * 1024 * 1024, max(16 * 1024 * 1024, 2 * working_set))

    grid_spec = pltpu.PrefetchScalarGridSpec(
        num_scalar_prefetch=1,                               # true batch size B
        grid=(num_tiles,),
        in_specs=[
            pl.BlockSpec((1, total), lambda i, nrows: (0, 0)),        # w_row
            pl.BlockSpec((tile_b, total), lambda i, nrows: (i, 0)),   # outputs tile
            pl.BlockSpec((tile_b, total), lambda i, nrows: (i, 0)),   # labels tile
        ],
        out_specs=pl.BlockSpec((8, 128), lambda i, nrows: (i, 0)),    # per-tile partial
    )

    cost = pl.CostEstimate(
        flops=3 * B * total,
        bytes_accessed=2 * B * total * itemsize + num_tiles * 8 * 128 * 4,
        transcendentals=0,
    )

    partials = pl.pallas_call(
        _mtl_kernel,
        grid_spec=grid_spec,
        out_shape=jax.ShapeDtypeStruct((num_tiles * 8, 128), jnp.float32),
        compiler_params=pltpu.CompilerParams(
            dimension_semantics=("parallel",),
            vmem_limit_bytes=int(vmem_limit)),
        cost_estimate=cost,
    )(jnp.array([B], dtype=jnp.int32), w_row, outputs, labels)

    # Tiny final reduction + Uncertainty.regularization() in the wrapper.
    total_loss = jnp.sum(partials[0::8, 0])
    total_loss += jnp.sum(log_variance / 2.0)
    return total_loss


def multi_task_loss_ref(outputs, labels, log_variance, num_tasks):
    """Pure-JAX reference matching the PyTorch MultiTaskLoss forward
    (Uncertainty weighter, train=True)."""
    B, total = outputs.shape
    D = total // num_tasks
    loss_weights = 0.5 * jnp.exp(-log_variance)
    task_losses = []
    for i in range(num_tasks):
        o = outputs[:, i * D:(i + 1) * D].astype(jnp.float32)
        l = labels[:, i * D:(i + 1) * D].astype(jnp.float32)
        task_losses.append(jnp.mean((o - l) ** 2))
    task_losses = jnp.stack(task_losses)
    total_loss = jnp.sum(task_losses * loss_weights)
    total_loss += jnp.sum(log_variance / 2.0)   # Uncertainty.regularization()
    return total_loss


if __name__ == "__main__":
    num_tasks = 3
    B, D = 16, 128      # per-task slice: (16, 128); full slab (16, 384)

    key = jax.random.PRNGKey(0)
    k1, k2 = jax.random.split(key)
    outputs = jax.random.normal(k1, (B, num_tasks * D), dtype=jnp.float32)
    labels = jax.random.normal(k2, (B, num_tasks * D), dtype=jnp.float32)

    # Deterministic parameter setup (mirrors Uncertainty.__init__):
    initial_loss_weights = jnp.array([1.0, 2.0, 0.5], dtype=jnp.float32)
    log_variance = -jnp.log(2.0 * initial_loss_weights)

    # TODO(synk): LossWeighter subclasses that require autograd w.r.t. network
    # params or host-side state/file I/O (GradNorm / SLW / SLAW / SLAWTester)
    # have no in-kernel equivalent; the Uncertainty weighter is implemented.

    loss = multi_task_loss(outputs, labels, log_variance, num_tasks)
    loss = jax.block_until_ready(loss)

    ref = multi_task_loss_ref(outputs, labels, log_variance, num_tasks)
    assert jnp.allclose(loss, ref, rtol=1e-5, atol=1e-5), (loss, ref)

    print("KERNEL_OK")
</pallas_src>

<mosaic_0001>
module attributes {stable_mosaic.version = 11 : i64} {
  func.func @_mtl_kernel(%arg0: i32, %arg1: memref<1xi32, #tpu.memory_space<smem>>, %arg2: memref<1x384xf32, #tpu.memory_space<vmem>>, %arg3: memref<8x384xf32, #tpu.memory_space<vmem>>, %arg4: memref<8x384xf32, #tpu.memory_space<vmem>>, %arg5: memref<8x128xf32, #tpu.memory_space<vmem>>) attributes {dimension_semantics = [#tpu.dimension_semantics<parallel>], iteration_bounds = array<i64: 2>, scalar_prefetch = 1 : i64, scratch_operands = 0 : i64, tpu.core_type = #tpu.core_type<tc>, window_params = [{pipeline_mode = #tpu.pipeline_mode<synchronous>, transform_indices = @transform_0, window_bounds = array<i64: 1, 384>}, {transform_indices = @transform_1, window_bounds = array<i64: 8, 384>}, {transform_indices = @transform_2, window_bounds = array<i64: 8, 384>}, {transform_indices = @transform_3, window_bounds = array<i64: 8, 128>}]} {
    %c8_i32 = arith.constant 8 : i32
    %0 = arith.muli %arg0, %c8_i32 : i32
    %1 = tpu.iota {dimensions = array<i32: 0>} : vector<8x1xi32>
    %2 = vector.broadcast %0 : i32 to vector<8x1xi32>
    %3 = arith.addi %2, %1 : vector<8x1xi32>
    %c0 = arith.constant 0 : index
    %4 = memref.load %arg1[%c0] : memref<1xi32, #tpu.memory_space<smem>>
    %5 = vector.broadcast %4 : i32 to vector<8x1xi32>
    %6 = arith.cmpi slt, %3, %5 : vector<8x1xi32>
    %c0_0 = arith.constant 0 : index
    %c0_1 = arith.constant 0 : index
    %7 = vector.load %arg3[%c0_0, %c0_1] : memref<8x384xf32, #tpu.memory_space<vmem>>, vector<8x384xf32>
    %c0_2 = arith.constant 0 : index
    %c0_3 = arith.constant 0 : index
    %8 = vector.load %arg4[%c0_2, %c0_3] : memref<8x384xf32, #tpu.memory_space<vmem>>, vector<8x384xf32>
    %9 = arith.subf %7, %8 : vector<8x384xf32>
    %cst = arith.constant 0.000000e+00 : f32
    %10 = vector.shape_cast %6 : vector<8x1xi1> to vector<8x1xi1>
    %11 = vector.broadcast %10 : vector<8x1xi1> to vector<8x384xi1>
    %12 = vector.broadcast %cst : f32 to vector<8x384xf32>
    %13 = arith.select %11, %9, %12 : vector<8x384xi1>, vector<8x384xf32>
    %14 = arith.mulf %13, %13 : vector<8x384xf32>
    %cst_4 = arith.constant dense<0.000000e+00> : vector<384xf32>
    %15 = vector.multi_reduction <add>, %14, %cst_4 [0] : vector<8x384xf32> to vector<384xf32>
    %16 = vector.shape_cast %15 : vector<384xf32> to vector<1x384xf32>
    %c0_5 = arith.constant 0 : index
    %c0_6 = arith.constant 0 : index
    %17 = vector.load %arg2[%c0_5, %c0_6] : memref<1x384xf32, #tpu.memory_space<vmem>>, vector<1x384xf32>
    %18 = arith.mulf %17, %16 : vector<1x384xf32>
    %19 = vector.shape_cast %18 : vector<1x384xf32> to vector<1x1x384xf32>
    %cst_7 = arith.constant dense<0.000000e+00> : vector<1xf32>
    %20 = vector.multi_reduction <add>, %19, %cst_7 [1, 2] : vector<1x1x384xf32> to vector<1xf32>
    %21 = vector.shape_cast %20 : vector<1xf32> to vector<1x1x1xf32>
    %22 = vector.extract %21[0, 0, 0] : f32 from vector<1x1x1xf32>
    %23 = vector.broadcast %22 : f32 to vector<8x128xf32>
    %c0_8 = arith.constant 0 : index
    %c0_9 = arith.constant 0 : index
    %24 = vector.load %arg5[%c0_8, %c0_9] : memref<8x128xf32, #tpu.memory_space<vmem>>, vector<8x128xf32>
    tpu.vector_store %arg5[%c0_8, %c0_9], %23 {strides = array<i32>} : memref<8x128xf32, #tpu.memory_space<vmem>>, vector<8x128xf32>,
    return
  }
  func.func @transform_0(%arg0: i32, %arg1: memref<1xi32, #tpu.memory_space<smem>>) -> (i32, i32) {
    %c0_i32 = arith.constant 0 : i32
    %c0_i32_0 = arith.constant 0 : i32
    %c0_i32_1 = arith.constant 0 : i32
    return %c0_i32, %c0_i32_0 : i32, i32
  }
  func.func @transform_1(%arg0: i32, %arg1: memref<1xi32, #tpu.memory_space<smem>>) -> (i32, i32) {
    %c0_i32 = arith.constant 0 : i32
    %c0_i32_0 = arith.constant 0 : i32
    return %arg0, %c0_i32 : i32, i32
  }
  func.func @transform_2(%arg0: i32, %arg1: memref<1xi32, #tpu.memory_space<smem>>) -> (i32, i32) {
    %c0_i32 = arith.constant 0 : i32
    %c0_i32_0 = arith.constant 0 : i32
    return %arg0, %c0_i32 : i32, i32
  }
  func.func @transform_3(%arg0: i32, %arg1: memref<1xi32, #tpu.memory_space<smem>>) -> (i32, i32) {
    %c0_i32 = arith.constant 0 : i32
    %c0_i32_0 = arith.constant 0 : i32
    return %arg0, %c0_i32 : i32, i32
  }
}

</mosaic_0001>

<bundles_post_ra>
// kernel: tpu_custom_call.1
= control target key start
LH: loop header
LB: loop body
LE: loop exit
PB: predicated region body
PF: predicated region fallthrough
CT: control target
= control target key end

     0   :  { %s882_s0 = inlined_call_operand.<no memory space> [shape: s32[1], index: 0, kind: input, shape index: {}]   ;;  %s883_s1 = inlined_call_operand.vmem [shape: f32[1,384], index: 1, kind: input, shape index: {}]   ;;  %s884_s2 = inlined_call_operand.hbm [shape: f32[16,384], index: 2, kind: input, shape index: {}]   ;;  %s885_s3 = inlined_call_operand.hbm [shape: f32[16,384], index: 3, kind: input, shape index: {}]   ;;  %s886_s4 = inlined_call_operand.hbm [shape: f32[16,128], index: 4, kind: output, shape index: {}]  }
   0x1   :  { %9 = sst [smem:[#allocation3]] %s882_s0 }
   0x2   :  { %10 = vsyncpa [#allocation5], 0 }
   0x3   :  { %12 = vsyncpa [#allocation5 + $0x1], 0 }
   0x4   :  { %13 = vsyncpa [#allocation8], 0 }
   0x5   :  { %15 = vsyncpa [#allocation8 + $0x1], 0 }
   0x6   :  { %16 = vsyncpa [#allocation6], 0 }
   0x7   :  { %18 = vsyncpa [#allocation6 + $0x1], 0  ;;  %s674_s17 = smov 0   ;;  %s676_s18 = smov 0  }
   0x8   :  { %s678_s19 = smov 0   ;;  %s680_s20 = smov 0  }
   0x9 LB: > { %s695_s0 = sadd.s32 4294967295, %s640_s20   ;;  %s439_s21 = sadd.s32 4294967294, %s640_s20   ;;  %s640_s20 = sphi %s680_s20, %s904_s20   ;;  %s636_s19 = sphi %s678_s19, %s903_s19   ;;  %s632_s18 = sphi %s676_s18, %s902_s18   ;;  %s628_s17 = sphi %s674_s17, %s901_s17  }
   0xa   : > { %s699_s22 = sadd.s32 1, %s640_s20   ;;  %s52_s23 = sadd.s32 1, %s636_s19 }
   0xb   : > { %s49_s24 = ssub.s32 %s640_s20, %s699_s22  ;;  %p59_p0 = scmp.ne.s32.totalorder %s636_s19, %s632_s18 }
   0xc   : > { %p50_p1 = scmp.eq.s32.totalorder %s49_s24, 0  ;;  %p60_p2 = scmp.eq.s32.totalorder %s640_s20, 0 }
   0xd   : > { %p65_p3 = scmp.ne.s32.totalorder %s632_s18, %s628_s17  ;;  %p66_p4 = scmp.eq.s32.totalorder %s695_s0, 0 }
   0xe   : > { %s711_s25 = scalar_select %p50_p1, %s636_s19, %s52_s23  }
   0xf   : > { %p61_p5 = por %p60_p2, %p59_p0  ;;  %p713_p6 = por %p66_p4, %p65_p3 }
  0x10   : > { %p115_p7 = scmp.eq.s32.totalorder %s695_s0, 1  ;;  %p121_p8 = scmp.eq.s32.totalorder %s439_s21, 1 }
  0x11   : > { %s889_s26 = scalar_select %p713_p6, 1, 0 }
  0x12   : > { %p475_p10 = scmp.lt.s32.totalorder %s640_s20, 2  ;;  %p720_p11 = por %p115_p7, %p59_p0 }
  0x13   : > { %p724_p12 = por %p121_p8, %p65_p3  ;;  %s729_s29 = sand.u32 1, %s636_s19  }
  0x14   : > { %s890_s27 = scalar_select %p720_p11, 1, 0 }
  0x15   : > { %s891_s28 = scalar_select %p724_p12, 1, 0 }
  0x16   : > { %s452_s30 = smul.u32 384, %s640_s20  ;;  %p740_p13 = pnand %p475_p10, %p61_p5 }
  0x17   : > { %s451_s5 = smul.u32 24, %s729_s29  ;;  %s145_s12 = scalar_lea.sflag [#allocation5], %s729_s29 }
  0x18   : > { %s738_s8 = scalar_lea.hbm %s884_s2, %s452_s30  ;;  %p512_p3 = pneg %p740_p13 }
  0x19   : > { %s148_s10 = scalar_lea.vmem [#allocation4], %s451_s5  ;;  %s510_s13 = scalar_lea.hbm %s738_s8, 384 }
  0x1a   : > { %s156_s11 = sshll.u32 %s148_s10, 4  ;;  %p511_p2 = scmp.ne.s32.totalorder %s738_s8, %s510_s13  ;;  %s747_s11 = int_to_ptr.vmem [resolvable:$true] %s156_s11 }
  0x1b   : > { %s515_s16 = scalar_lea.hbm %s884_s2, 768  ;;  %p516_p7 = scmp.lt.u32.totalorder %s738_s8, %s884_s2 }
  0x1c   : > { %p513_p4 = pnand %p512_p3, %p511_p2  ;;  %p517_p8 = scmp.lt.u32.totalorder %s515_s16, %s510_s13 }
  0x1d   : > { %p519_p9 = scmp.lt.u32.totalorder %s510_s13, %s738_s8 }
  0x1e   : > { %p514_p5 = pneg %p513_p4  ;;  %p518_p10 = por %p517_p8, %p516_p7 }
  0x20   : > { %p520_p0 = por %p519_p9, %p518_p10 }
  0x22   : > { %p521_p1 = pnand %p520_p0, %p514_p5 }
  0x24   : > { %524 = shalt.err (!%p521_p1)
}
  0x25   : > { %s525_s24 = scalar_lea.vmem %s747_s11, 384  ;;  %s642_s6 = smov [#allocation4]  }
  0x26   : > { %p526_p2 = scmp.ne.s32.totalorder %s747_s11, %s525_s24  ;;  %s530_s7 = sshll.u32 %s642_s6, 4  ;;  %s531_s7 = int_to_ptr.vmem [resolvable:$false] %s530_s7 }
  0x27   : > { %s532_s10 = scalar_lea.vmem %s531_s7, 768  ;;  %p533_p11 = scmp.lt.s32.totalorder %s747_s11, %s531_s7 }
  0x28   : > { %p528_p4 = pnand %p526_p2, %p512_p3  ;;  %p534_p7 = scmp.lt.s32.totalorder %s532_s10, %s525_s24 }
  0x2a   : > { %p529_p12 = pneg %p528_p4  ;;  %p535_p8 = por %p534_p7, %p533_p11 }
  0x2c   : > { %p536_p9 = pnand %p535_p8, %p529_p12 }
  0x2e   : > { %539 = shalt.err (!%p536_p9)
}
  0x2f   : > { %467 = dma.hbm_to_vmem [thread:$0]  (!%p740_p13), %s738_s8, 384, %s747_s11, %s145_s12  }
  0x30   : > { %p893_p0 = scmp.lt.s32.totalorder %s640_s20, 3  ;;  %p894_p1 = scmp.ge.s32.totalorder %s640_s20, 1 }
  0x31   : > { %s789_s16 = scalar_lea.hbm %s885_s3, %s452_s30  ;;  %s167_s21 = scalar_lea.vmem [#allocation7], %s451_s5 }
  0x32   : > { %p780_p5 = pnand %p894_p1, %p893_p0  ;;  %s175_s23 = sshll.u32 %s167_s21, 4  ;;  %s176_s23 = int_to_ptr.vmem [resolvable:$true] %s175_s23 }
  0x33   : > { %s164_s8 = scalar_lea.sflag [#allocation8], %s729_s29  ;;  %s540_s11 = scalar_lea.hbm %s789_s16, 384 }
  0x34   : > { %s895_s13 = scalar_select %p780_p5, 1, 0 }
  0x35   : > { %p541_p11 = scmp.ne.s32.totalorder %s789_s16, %s540_s11  ;;  %s545_s30 = scalar_lea.hbm %s885_s3, 768 }
  0x36   : > { %p546_p2 = scmp.lt.u32.totalorder %s789_s16, %s885_s3  ;;  %p547_p4 = scmp.lt.u32.totalorder %s545_s30, %s540_s11 }
  0x37   : > { %p543_p12 = pnand %p541_p11, %p512_p3  ;;  %p549_p8 = scmp.lt.u32.totalorder %s540_s11, %s789_s16 }
  0x38   : > { %p548_p7 = por %p547_p4, %p546_p2 }
  0x39   : > { %p544_p10 = pneg %p543_p12 }
  0x3a   : > { %p550_p9 = por %p549_p8, %p548_p7 }
  0x3c   : > { %p551_p0 = pnand %p550_p9, %p544_p10 }
  0x3e   : > { %554 = shalt.err (!%p551_p0)
}
  0x3f   : > { %s555_s29 = scalar_lea.vmem %s176_s23, 384  ;;  %s643_s5 = smov [#allocation7]  }
  0x40   : > { %p556_p1 = scmp.ne.s32.totalorder %s176_s23, %s555_s29  ;;  %s560_s10 = sshll.u32 %s643_s5, 4  ;;  %s561_s10 = int_to_ptr.vmem [resolvable:$false] %s560_s10 }
  0x41   : > { %s562_s14 = scalar_lea.vmem %s561_s10, 768  ;;  %p563_p6 = scmp.lt.s32.totalorder %s176_s23, %s561_s10 }
  0x42   : > { %p558_p11 = pnand %p556_p1, %p512_p3  ;;  %p564_p5 = scmp.lt.s32.totalorder %s562_s14, %s555_s29 }
  0x44   : > { %p559_p12 = pneg %p558_p11  ;;  %p565_p2 = por %p564_p5, %p563_p6 }
  0x46   : > { %p566_p4 = pnand %p565_p2, %p559_p12 }
  0x48   : > { %569 = shalt.err (!%p566_p4)
}
  0x49   : > { %470 = dma.hbm_to_vmem [thread:$0]  (!%p740_p13), %s789_s16, 384, %s176_s23, %s164_s8  }
  0x4a   : > { %p896_p10 = scmp.ne.s32.totalorder %s895_s13, 0 }
  0x4b   : > { %s816_s15 = sand.u32 (!%p896_p10), 1, %s632_s18   ;;  %p897_p3 = scmp.ne.s32.totalorder (!%p896_p10), %s889_s26, 0 }
  0x4c   : > { %184 = sbr.rel (%p896_p10) target bundleno = 345 (0x159), region = 32  ;;  %s187_s11 = scalar_lea.sflag (!%p896_p10), [#allocation5], %s816_s15 }
  0x4d   : > { %s455_s21 = smul.u32 (!%p896_p10), 24, %s816_s15 }
  0x4f   : > { %s190_s12 = scalar_lea.vmem (!%p896_p10), [#allocation4], %s455_s21 }
  0x53   : > { %615 = dma.done.wait (%p897_p3), %s187_s11, 384  }
  0x54   : > { %617 = vsyncadd (%p897_p3), %s187_s11, 4294966912  ;;  %s196_s9 = scalar_lea.sflag [#allocation8], %s816_s15  ;;  %s199_s16 = scalar_lea.vmem [#allocation7], %s455_s21 }
  0x55   : > { %619 = dma.done.wait (%p897_p3), %s196_s9, 384  }
  0x56   : > { %621 = vsyncadd (%p897_p3), %s196_s9, 4294966912  ;;  %s446_s13 = sshll.u32 %s695_s0, 3  ;;  %v228_v0 = vlaneseq  ;;  %s232_s23 = sld [smem:[#allocation3]]  ;;  %v235_v5 = vld [vmem:[%s190_s12] sm:$0xff]  ;;  %v236_v6 = vld [vmem:[%s190_s12 + $0x8] sm:$0xff]  ;;  %vm315_vm1 = vcmask 1040384  }
  0x57   : > { %v230_v1 = vstv %s446_s13  ;;  %v237_v7 = vld [vmem:[%s190_s12 + $0x10] sm:$0xff]  ;;  %v239_v9 = vld [vmem:[%s199_s16 + $0x8] sm:$0xff]  ;;  %v240_v10 = vld [vmem:[%s199_s16 + $0x10] sm:$0xff]  ;;  %v644_v23 = vmov 1966171168   ;;  %s445_s24 = sshll.u32 %s816_s15, 3 }
  0x58   : > { %v229_v2 = vshrl.u32 %v228_v0, 7  ;;  %v238_v8 = vld [vmem:[%s199_s16] sm:$0xff]  ;;  %v242_v12 = vsub.f32 %v236_v6, %v239_v9  ;;  %v243_v13 = vsub.f32 %v237_v7, %v240_v10  ;;  %v276_v24 = vunpack.c.l.s4 %v644_v23  ;;  %v270_v46 = vld [vmem:[%s883_s1] sm:$0x7]  ;;  %s226_s30 = scalar_lea.vmem [#allocation9], %s445_s24  ;;  %s448_s7 = sshll.u32 %s695_s0, 7 }
  0x59   : > { %v241_v11 = vsub.f32 %v235_v5, %v238_v8  ;;  %s346_s6 = sshll.u32 %s226_s30, 4  ;;  %s840_s14 = scalar_lea.hbm %s886_s4, %s448_s7  ;;  %s835_s6 = int_to_ptr.vmem [resolvable:$true] %s346_s6 }
  0x5a   : > { %v231_v3 = vadd.s32 %v230_v1, %v229_v2  ;;  %v277_v31 = vunpack.c.0.s8 %v276_v24  ;;  %v302_v48 = vsub.s32 0, %v229_v2  ;;  %v306_v49 = vsub.s32 1, %v229_v2  ;;  %s333_s21 = scalar_lea.sflag [#allocation6], %s816_s15  ;;  %s570_s11 = scalar_lea.vmem %s835_s6, 128 }
  0x5b   : > { %v310_v50 = vsub.s32 2, %v229_v2  ;;  %p571_p6 = scmp.ne.s32.totalorder %s835_s6, %s570_s11  ;;  %p898_p13 = scmp.ne.s32.totalorder %s890_s27, 0 }
  0x5c   : > { %v233_v4 = vstv %s232_s23  ;;  %v280_v38 = vsub.s32 %v277_v31, %v229_v2  ;;  %s645_s0 = smov [#allocation9]  }
  0x5d   : > { %vm234_vm0 = vcmp.lt.s32.totalorder %v231_v3, %v233_v4  ;;  %p572_p5 = pnand %p571_p6, %p898_p13  ;;  %s574_s12 = sshll.u32 %s645_s0, 4  ;;  %s575_s12 = int_to_ptr.vmem [resolvable:$false] %s574_s12 }
  0x5e   : > { %v246_v14 = vsel %vm234_vm0, %v241_v11, 0.0  ;;  %v247_v15 = vsel %vm234_vm0, %v242_v12, 0.0  ;;  %v248_v16 = vsel %vm234_vm0, %v243_v13, 0.0  ;;  %s576_s9 = scalar_lea.vmem %s575_s12, 256  ;;  %p577_p8 = scmp.lt.s32.totalorder %s835_s6, %s575_s12 }
  0x5f   : > { %v249_v17 = vmul.f32 %v246_v14, %v246_v14  ;;  %v250_v18 = vmul.f32 %v247_v15, %v247_v15  ;;  %v251_v19 = vmul.f32 %v248_v16, %v248_v16  ;;  %p573_p7 = pneg %p572_p5  ;;  %p578_p9 = scmp.lt.s32.totalorder %s576_s9, %s570_s11 }
  0x61   : > { %v252_v20 = vrot.slane %v249_v17, 4  ;;  %v258_v21 = vrot.slane %v250_v18, 4  ;;  %v264_v22 = vrot.slane %v251_v19, 4  ;;  %p579_p0 = por %p578_p9, %p577_p8 }
  0x63   : > { %v253_v25 = vadd.f32 %v252_v20, %v249_v17  ;;  %v259_v26 = vadd.f32 %v258_v21, %v250_v18  ;;  %v265_v27 = vadd.f32 %v264_v22, %v251_v19  ;;  %p580_p1 = pnand %p579_p0, %p573_p7 }
  0x65   : > { %v254_v28 = vrot.slane %v253_v25, 2  ;;  %v260_v29 = vrot.slane %v259_v26, 2  ;;  %v266_v30 = vrot.slane %v265_v27, 2 }
  0x67   : > { %v255_v32 = vadd.f32 %v254_v28, %v253_v25  ;;  %v261_v33 = vadd.f32 %v260_v29, %v259_v26  ;;  %v267_v34 = vadd.f32 %v266_v30, %v265_v27 }
  0x69   : > { %v256_v35 = vrot.slane %v255_v32, 1  ;;  %v262_v36 = vrot.slane %v261_v33, 1  ;;  %v268_v37 = vrot.slane %v267_v34, 1 }
  0x6b   : > { %v257_v39 = vadd.f32 %v256_v35, %v255_v32  ;;  %v263_v40 = vadd.f32 %v262_v36, %v261_v33  ;;  %v269_v41 = vadd.f32 %v268_v37, %v267_v34 }
  0x6d   : > { %v274_v42 = vcombine.low %v257_v39, %v263_v40  ;;  %v288_v43 = vrot.slane %v269_v41, %v280_v38 }
  0x6f   : > { %v281_v44 = vrot.slane %v274_v42, %v280_v38 }
  0x71   : > { %v289_v45 = vcombine.low %v281_v44, %v288_v43 }
  0x73   : > { %v296_v47 = vrot.slane %v289_v45, %v280_v38 }
  0x75   : > { %v298_v51 = vmul.f32 %v296_v47, %v270_v46 }
  0x77   : > { %v303_v52 = vrot.slane %v298_v51, %v302_v48  ;;  %v307_v53 = vrot.slane %v298_v51, %v306_v49  ;;  %v311_v54 = vrot.slane %v298_v51, %v310_v50 }
  0x79   : > { %v316_v55 = vsel %vm315_vm1, %v303_v52, 0.0  ;;  %v317_v56 = vsel %vm315_vm1, %v307_v53, 0.0  ;;  %v319_v57 = vsel %vm315_vm1, %v311_v54, 0.0 }
  0x7a   : > { %v318_v58 = vadd.f32 %v317_v56, %v316_v55 }
  0x7c   : > { %v320_v59 = vadd.f32 %v319_v57, %v318_v58 }
  0x7e   : > { %321 = vadd.xlane.f32.xlu0 %v320_v59 }
 0x10b   : > { %v322_v60 = vpop.xlane.xlu0 %321 }
 0x10c   : > { %v323_v61 = vrot.slane %v322_v60, 4 }
 0x10e   : > { %v324_v62 = vadd.f32 %v323_v61, %v322_v60 }
 0x110   : > { %v325_v63 = vrot.slane %v324_v62, 2 }
 0x112   : > { %v326_v0 = vadd.f32 %v325_v63, %v324_v62 }
 0x114   : > { %v327_v1 = vrot.slane %v326_v0, 1 }
 0x116   : > { %v328_v2 = vadd.f32 %v327_v1, %v326_v0 }
 0x118   : > { %456 = vpush %v328_v2 }
 0x149   : > { %s457_s29 = spop %456 }
 0x14a   : > { %v330_v3 = vstv %s457_s29 }
 0x14b   : > { %331 = vst [vmem:[%s226_s30] sm:$0xff] %v330_v3 }
 0x14c   : > { %583 = shalt.err (!%p580_p1)
}
 0x14d   : > { %s584_s15 = scalar_lea.hbm %s840_s14, 128  ;;  %s588_s23 = scalar_lea.hbm %s886_s4, 256 }
 0x14e   : > { %p585_p11 = scmp.ne.s32.totalorder %s840_s14, %s584_s15  ;;  %p589_p4 = scmp.lt.u32.totalorder %s840_s14, %s886_s4 }
 0x14f   : > { %p590_p10 = scmp.lt.u32.totalorder %s588_s23, %s584_s15  ;;  %p592_p6 = scmp.lt.u32.totalorder %s584_s15, %s840_s14 }
 0x150   : > { %p586_p12 = pnand %p585_p11, %p898_p13 }
 0x151   : > { %p591_p3 = por %p590_p10, %p589_p4 }
 0x152   : > { %p587_p2 = pneg %p586_p12 }
 0x153   : > { %p593_p5 = por %p592_p6, %p591_p3 }
 0x155   : > { %p594_p7 = pnand %p593_p5, %p587_p2 }
 0x157   : > { %597 = shalt.err (!%p594_p7)
}
 0x158   : > { %462 = dma.vmem_to_hbm [thread:$0]  (%p898_p13), %s835_s6, 128, %s840_s14, %s333_s21  }
 0x159 PF: > { %s358_s24 = sand.u32 1, %s628_s17   ;;  %p899_p8 = scmp.ne.s32.totalorder %s891_s28, 0 }
 0x15a   : > { %p900_p9 = scmp.ge.s32.totalorder %s640_s20, 2  ;;  %s359_s30 = scalar_lea.sflag [#allocation6], %s358_s24 }
 0x15c   : > { %p472_p0 = pnand %p900_p9, %p899_p8 }
 0x15e   : > { %623 = dma.done.wait (!%p472_p0), %s359_s30, 128  }
 0x15f   : > { %625 = vsyncadd (!%p472_p0), %s359_s30, 4294967168  ;;  %p21_p1 = scmp.ge.s32.totalorder %s699_s22, 4   ;;  %s901_s17 = smov %s632_s18 }
 0x160   : > { %s902_s18 = smov %s636_s19  ;;  %s903_s19 = smov %s711_s25 }
 0x161   : > { %s904_s20 = smov %s699_s22  ;;  %23 = sbr.rel (!%p21_p1) target bundleno = 9 (0x9), region = 90 }
 0x168   :  { %364 = vsyncpa [#allocation5], 1 }
 0x169   :  { %366 = vsyncpa [#allocation5 + $0x1], 1 }
 0x16a   :  { %367 = vsyncpa [#allocation8], 1 }
 0x16b   :  { %369 = vsyncpa [#allocation8 + $0x1], 1 }
 0x16c   :  { %370 = vsyncpa [#allocation6], 1 }
 0x16d   :  { %372 = vsyncpa [#allocation6 + $0x1], 1 }

</bundles_post_ra>
